<compile_context>
chip_gen: v7x
topology: tpu7x:2x2x1
jax: 0.10.0
libtpu: 0.0.40
codegen_flags: <defaults>
</compile_context>

<pallas_src>
import functools

import jax
import jax.numpy as jnp
from jax import lax
from jax.experimental import pallas as pl
from jax.experimental.pallas import tpu as pltpu


# ----------------------------- Pallas kernel --------------------------------

def _make_gemm_kernel(negative_slope):
    """(TM, Kp)bf16 @ (Kp, Cp)bf16 -> f32 acc, + shift, activation, store f32."""

    def kernel(patches_ref, w_ref, shift_ref, out_ref):
        acc = jnp.dot(patches_ref[...], w_ref[...],
                      preferred_element_type=jnp.float32)
        y = acc + shift_ref[...]                     # BN shift (scale folded in W)
        if negative_slope == 0.0:
            y = jnp.maximum(y, 0.0)                  # ReLU
        else:
            y = jnp.where(y >= 0.0, y, negative_slope * y)  # LeakyReLU
        out_ref[...] = y.astype(out_ref.dtype)

    return kernel


def _gemm_shift_act(patches, w_kc, shift, *, negative_slope, tm):
    """patches (Mp, Kp) bf16, w_kc (Kp, Cp) bf16, shift (1, Cp) f32 -> (Mp, Cp) f32."""
    Mp, Kp = patches.shape
    Kw, Cp = w_kc.shape
    assert Kp == Kw and Mp % tm == 0

    grid_spec = pltpu.PrefetchScalarGridSpec(
        num_scalar_prefetch=0,
        grid=(Mp // tm,),
        in_specs=[
            pl.BlockSpec((tm, Kp), lambda i: (i, 0)),   # patches: tile over M
            pl.BlockSpec((Kp, Cp), lambda i: (0, 0)),   # weights: resident
            pl.BlockSpec((1, Cp), lambda i: (0, 0)),    # BN shift: resident
        ],
        out_specs=pl.BlockSpec((tm, Cp), lambda i: (i, 0)),
    )
    return pl.pallas_call(
        _make_gemm_kernel(negative_slope),
        out_shape=jax.ShapeDtypeStruct((Mp, Cp), jnp.float32),
        grid_spec=grid_spec,
        compiler_params=pltpu.CompilerParams(
            dimension_semantics=("parallel",),          # megacore-shardable on v7x
            vmem_limit_bytes=64 * 1024 * 1024,
        ),
    )(patches, w_kc, shift)


# ------------------------------ JAX wrapper ----------------------------------

def _round_up(x, m):
    return ((x + m - 1) // m) * m


def _im2col_2d(x_pad, kernel, stride, out_hw):
    """x_pad: (N, Cin, Hp, Wp) -> patches (N*Ho*Wo, Cin*k*k), K ordered (ci, kh, kw)."""
    N, Cin = x_pad.shape[0], x_pad.shape[1]
    Ho, Wo = out_hw
    cols = []
    for kh in range(kernel):
        for kw in range(kernel):
            sl = x_pad[:, :,
                       kh:kh + (Ho - 1) * stride + 1:stride,
                       kw:kw + (Wo - 1) * stride + 1:stride]
            cols.append(sl)                              # (N, Cin, Ho, Wo)
    patches = jnp.stack(cols, axis=0)                    # (k*k, N, Cin, Ho, Wo)
    patches = jnp.transpose(patches, (1, 3, 4, 2, 0))    # (N, Ho, Wo, Cin, k*k)
    return patches.reshape(N * Ho * Wo, Cin * kernel * kernel)


@functools.partial(jax.jit,
                   static_argnames=("kernel", "stride", "padding", "act", "eps"))
def block_forward(x, weight, gamma, beta, running_mean, running_var, *,
                  kernel=4, stride=2, padding=1, act="relu", eps=1e-5):
    """Forward of `Block` (down=True, eval mode). x: (N, Cin, H, W) float32."""
    N, Cin, H, W = x.shape
    Cout = weight.shape[0]

    # Reflect padding (padding_mode='reflect').
    pad = ((0, 0), (0, 0), (padding, padding), (padding, padding))
    x_pad = jnp.pad(x, pad, mode="reflect")

    Ho = (H + 2 * padding - kernel) // stride + 1
    Wo = (W + 2 * padding - kernel) // stride + 1

    # im2col (glue) -> Pallas GEMM + BN + activation (hot path).
    patches = _im2col_2d(x_pad, kernel, stride, (Ho, Wo))      # (M, K) f32
    M, K = patches.shape

    # Fold BatchNorm2d (eval) into the weights (scale) and a per-channel shift.
    inv_std = lax.rsqrt(running_var + eps)
    scale = gamma * inv_std                                    # (Cout,)
    shift = beta - running_mean * scale                        # (Cout,)
    w_kc = weight.reshape(Cout, K).T * scale[None, :]          # (K, Cout) f32, BN-scaled

    # Pad K / Cout to multiples of 128 (dense lanes / MXU), M to a tile multiple.
    Kp = _round_up(K, 128)
    Cp = _round_up(Cout, 128)
    TM = min(512, _round_up(M, 8))
    Mp = _round_up(M, TM)

    patches_p = jnp.zeros((Mp, Kp), jnp.bfloat16)
    patches_p = patches_p.at[:M, :K].set(patches.astype(jnp.bfloat16))
    w_p = jnp.zeros((Kp, Cp), jnp.bfloat16)
    w_p = w_p.at[:K, :Cout].set(w_kc.astype(jnp.bfloat16))
    shift_p = jnp.zeros((1, Cp), jnp.float32)
    shift_p = shift_p.at[0, :Cout].set(shift)

    negative_slope = 0.0 if act == "relu" else 0.2
    out_mc = _gemm_shift_act(patches_p, w_p, shift_p,
                             negative_slope=negative_slope, tm=TM)  # (Mp, Cp) f32

    out = out_mc[:M, :Cout].reshape(N, Ho, Wo, Cout)
    out = jnp.transpose(out, (0, 3, 1, 2))                     # back to NCHW
    # Dropout in eval mode (and use_dropout=False default) is identity.
    return out


# ------------------------------ Reference ------------------------------------

def _reference_forward(x, weight, gamma, beta, running_mean, running_var,
                       kernel=4, stride=2, padding=1, act="relu", eps=1e-5):
    pad = ((0, 0), (0, 0), (padding, padding), (padding, padding))
    x_pad = jnp.pad(x, pad, mode="reflect")
    conv = lax.conv_general_dilated(
        x_pad, weight, window_strides=(stride, stride), padding="VALID",
        dimension_numbers=("NCHW", "OIHW", "NCHW"))
    inv_std = lax.rsqrt(running_var + eps)
    scale = (gamma * inv_std).reshape(1, -1, 1, 1)
    shift = (beta - running_mean * gamma * inv_std).reshape(1, -1, 1, 1)
    y = conv * scale + shift
    if act == "relu":
        return jnp.maximum(y, 0.0)
    return jnp.where(y >= 0.0, y, 0.2 * y)


# --------------------------------- Main ---------------------------------------

if __name__ == "__main__":
    key = jax.random.PRNGKey(0)
    k_x, k_w, k_g, k_b, k_m, k_v = jax.random.split(key, 6)

    N, Cin, H, W = 2, 4, 16, 16
    Cout, kernel, stride, padding = 8, 4, 2, 1

    x = jax.random.normal(k_x, (N, Cin, H, W), dtype=jnp.float32)
    weight = 0.1 * jax.random.normal(k_w, (Cout, Cin, kernel, kernel),
                                     dtype=jnp.float32)
    gamma = 0.5 + jax.random.uniform(k_g, (Cout,), dtype=jnp.float32)
    beta = 0.1 * jax.random.normal(k_b, (Cout,), dtype=jnp.float32)
    running_mean = 0.1 * jax.random.normal(k_m, (Cout,), dtype=jnp.float32)
    running_var = 0.5 + jax.random.uniform(k_v, (Cout,), dtype=jnp.float32)

    Ho = (H + 2 * padding - kernel) // stride + 1
    Wo = (W + 2 * padding - kernel) // stride + 1

    for act in ("relu", "leaky"):
        out = block_forward(x, weight, gamma, beta, running_mean, running_var,
                            kernel=kernel, stride=stride, padding=padding, act=act)
        out = jax.block_until_ready(out)

        ref = _reference_forward(x, weight, gamma, beta, running_mean, running_var,
                                 kernel=kernel, stride=stride, padding=padding,
                                 act=act)
        ref = jax.block_until_ready(ref)

        assert out.shape == (N, Cout, Ho, Wo), out.shape
        # bf16 GEMM operands (f32 accumulation) vs f32 reference -> relaxed tolerance.
        max_err = jnp.max(jnp.abs(out - ref))
        assert jnp.allclose(out, ref, atol=5e-2, rtol=5e-2), (
            f"act={act}: max abs err = {max_err}")

    print("KERNEL_OK")
</pallas_src>

<mosaic_0001>
module attributes {stable_mosaic.version = 11 : i64} {
  func.func @kernel(%arg0: i32, %arg1: memref<128x128xbf16, #tpu.memory_space<vmem>>, %arg2: memref<128x128xbf16, #tpu.memory_space<vmem>>, %arg3: memref<1x128xf32, #tpu.memory_space<vmem>>, %arg4: memref<128x128xf32, #tpu.memory_space<vmem>>) attributes {dimension_semantics = [#tpu.dimension_semantics<parallel>], iteration_bounds = array<i64: 1>, scalar_prefetch = 0 : i64, scratch_operands = 0 : i64, tpu.core_type = #tpu.core_type<tc>, window_params = [{transform_indices = @transform_0, window_bounds = array<i64: 128, 128>}, {pipeline_mode = #tpu.pipeline_mode<synchronous>, transform_indices = @transform_1, window_bounds = array<i64: 128, 128>}, {pipeline_mode = #tpu.pipeline_mode<synchronous>, transform_indices = @transform_2, window_bounds = array<i64: 1, 128>}, {transform_indices = @transform_3, window_bounds = array<i64: 128, 128>}]} {
    %c0 = arith.constant 0 : index
    %c0_0 = arith.constant 0 : index
    %0 = vector.load %arg1[%c0, %c0_0] : memref<128x128xbf16, #tpu.memory_space<vmem>>, vector<128x128xbf16>
    %c0_1 = arith.constant 0 : index
    %c0_2 = arith.constant 0 : index
    %1 = vector.load %arg2[%c0_1, %c0_2] : memref<128x128xbf16, #tpu.memory_space<vmem>>, vector<128x128xbf16>
    %cst = arith.constant dense<0.000000e+00> : vector<128x128xf32>
    %2 = tpu.matmul %0, %1, %cst {dimension_numbers = #tpu.dot_dimension_numbers<[1], [0], [0], [1], [0, 0, 1, 1], [], []>} : vector<128x128xbf16>, vector<128x128xbf16>, vector<128x128xf32> -> vector<128x128xf32>
    %c0_3 = arith.constant 0 : index
    %c0_4 = arith.constant 0 : index
    %3 = vector.load %arg3[%c0_3, %c0_4] : memref<1x128xf32, #tpu.memory_space<vmem>>, vector<1x128xf32>
    %4 = vector.broadcast %3 : vector<1x128xf32> to vector<128x128xf32>
    %5 = arith.addf %2, %4 : vector<128x128xf32>
    %cst_5 = arith.constant 0.000000e+00 : f32
    %6 = vector.broadcast %cst_5 : f32 to vector<128x128xf32>
    %7 = arith.maximumf %5, %6 : vector<128x128xf32>
    %c0_6 = arith.constant 0 : index
    %c0_7 = arith.constant 0 : index
    %8 = vector.load %arg4[%c0_6, %c0_7] : memref<128x128xf32, #tpu.memory_space<vmem>>, vector<128x128xf32>
    tpu.vector_store %arg4[%c0_6, %c0_7], %7 {strides = array<i32>} : memref<128x128xf32, #tpu.memory_space<vmem>>, vector<128x128xf32>,
    return
  }
  func.func @transform_0(%arg0: i32) -> (i32, i32) {
    %c0_i32 = arith.constant 0 : i32
    %c0_i32_0 = arith.constant 0 : i32
    return %arg0, %c0_i32 : i32, i32
  }
  func.func @transform_1(%arg0: i32) -> (i32, i32) {
    %c0_i32 = arith.constant 0 : i32
    %c0_i32_0 = arith.constant 0 : i32
    %c0_i32_1 = arith.constant 0 : i32
    return %c0_i32, %c0_i32_0 : i32, i32
  }
  func.func @transform_2(%arg0: i32) -> (i32, i32) {
    %c0_i32 = arith.constant 0 : i32
    %c0_i32_0 = arith.constant 0 : i32
    %c0_i32_1 = arith.constant 0 : i32
    return %c0_i32, %c0_i32_0 : i32, i32
  }
  func.func @transform_3(%arg0: i32) -> (i32, i32) {
    %c0_i32 = arith.constant 0 : i32
    %c0_i32_0 = arith.constant 0 : i32
    return %arg0, %c0_i32 : i32, i32
  }
}

</mosaic_0001>

<bundles_post_ra>
// kernel: block_forward.1
= control target key start
LH: loop header
LB: loop body
LE: loop exit
PB: predicated region body
PF: predicated region fallthrough
CT: control target
= control target key end

     0   :  { %8 = vsyncpa [#allocation3], 0  ;;  %s619_s0 = inlined_call_operand.hbm [shape: bf16[128,128], index: 0, kind: input, shape index: {}]   ;;  %s620_s1 = inlined_call_operand.hbm [shape: bf16[128,128], index: 1, kind: input, shape index: {}]   ;;  %s621_s2 = inlined_call_operand.hbm [shape: f32[1,128], index: 2, kind: input, shape index: {}]   ;;  %s622_s3 = inlined_call_operand.hbm [shape: f32[128,128], index: 3, kind: output, shape index: {}]  }
   0x1   :  { %9 = vsyncpa [#allocation6], 0 }
   0x2   :  { %10 = vsyncpa [#allocation4], 0  ;;  %s536_s12 = smov [#allocation5]   ;;  %s537_s14 = smov [#allocation2]  }
   0x3   :  { %s28_s13 = sshll.u32 %s536_s12, 4  ;;  %s16_s15 = sshll.u32 %s537_s14, 4  ;;  %s29_s13 = int_to_ptr.vmem [resolvable:$true] %s28_s13  ;;  %s564_s15 = int_to_ptr.vmem [resolvable:$true] %s16_s15 }
   0x4   :  { %s442_s18 = scalar_lea.hbm %s620_s1, 1024 }
   0x5   :  { %p443_p0 = scmp.ne.s32.totalorder %s620_s1, %s442_s18  ;;  %p446_p1 = scmp.lt.u32.totalorder %s442_s18, %s620_s1 }
   0x7   :  { %p448_p2 = pnand %p446_p1, %p443_p0 }
   0x9   :  { %451 = shalt.err (!%p448_p2)
}
   0xa   :  { %s452_s23 = scalar_lea.vmem %s29_s13, 1024  ;;  %p457_p4 = scmp.lt.s32.totalorder %s29_s13, %s29_s13 }
   0xb   :  { %p453_p3 = scmp.ne.s32.totalorder %s29_s13, %s452_s23  ;;  %p458_p5 = scmp.lt.s32.totalorder %s452_s23, %s452_s23 }
   0xd   :  { %p459_p6 = por %p458_p5, %p457_p4 }
   0xf   :  { %p460_p7 = pnand %p459_p6, %p453_p3 }
  0x11   :  { %463 = shalt.err (!%p460_p7)
}
  0x12   :  { %s538_s24 = smov 64   ;;  %s539_s25 = smov 4  }
  0x13   :  { %34 = dma.hbm_to_vmem [thread:$0]  %s620_s1, 1024, %s29_s13, [#allocation6], %s538_s24, %s538_s24, %s539_s25  }
  0x14   :  { %s464_s30 = scalar_lea.hbm %s619_s0, 1024 }
  0x15   :  { %p465_p8 = scmp.ne.s32.totalorder %s619_s0, %s464_s30  ;;  %p468_p9 = scmp.lt.u32.totalorder %s464_s30, %s619_s0 }
  0x17   :  { %p470_p10 = pnand %p468_p9, %p465_p8 }
  0x19   :  { %473 = shalt.err (!%p470_p10)
}
  0x1a   :  { %s474_s8 = scalar_lea.vmem %s564_s15, 1024  ;;  %p479_p12 = scmp.lt.s32.totalorder %s564_s15, %s564_s15 }
  0x1b   :  { %p475_p11 = scmp.ne.s32.totalorder %s564_s15, %s474_s8  ;;  %p480_p13 = scmp.lt.s32.totalorder %s474_s8, %s474_s8 }
  0x1d   :  { %p481_p0 = por %p480_p13, %p479_p12 }
  0x1f   :  { %p482_p1 = pnand %p481_p0, %p475_p11 }
  0x21   :  { %485 = shalt.err (!%p482_p1)
}
  0x22   :  { %22 = dma.hbm_to_vmem [thread:$0]  %s619_s0, 1024, %s564_s15, [#allocation3], %s538_s24, %s538_s24, %s539_s25  }
  0x23   :  { %s540_s10 = smov [#allocation7]   ;;  %s486_s14 = scalar_lea.hbm %s621_s2, 16 }
  0x24   :  { %s41_s11 = sshll.u32 %s540_s10, 4  ;;  %p487_p2 = scmp.ne.s32.totalorder %s621_s2, %s486_s14  ;;  %s42_s11 = int_to_ptr.vmem [resolvable:$true] %s41_s11 }
  0x25   :  { %p490_p3 = scmp.lt.u32.totalorder %s486_s14, %s621_s2 }
  0x27   :  { %p492_p4 = pnand %p490_p3, %p487_p2 }
  0x29   :  { %495 = shalt.err (!%p492_p4)
}
  0x2a   :  { %s496_s20 = scalar_lea.vmem %s42_s11, 16  ;;  %s500_s0 = scalar_lea.vmem %s42_s11, 32 }
  0x2b   :  { %p497_p5 = scmp.ne.s32.totalorder %s42_s11, %s496_s20  ;;  %p501_p6 = scmp.lt.s32.totalorder %s42_s11, %s42_s11 }
  0x2c   :  { %p502_p7 = scmp.lt.s32.totalorder %s500_s0, %s496_s20 }
  0x2e   :  { %p503_p8 = por %p502_p7, %p501_p6 }
  0x30   :  { %p504_p9 = pnand %p503_p8, %p497_p5 }
  0x32   :  { %507 = shalt.err (!%p504_p9)
}
  0x33   :  { %44 = dma.hbm_to_vmem [thread:$0]  %s621_s2, 16, %s42_s11, [#allocation6]  }
  0x34   :  { %530 = dma.done.wait [#allocation3], 1024  }
  0x35   :  { %531 = vsyncadd [#allocation3], 4294966272 }
  0x36   :  { %532 = dma.done.wait [#allocation6], 1040  }
  0x37   :  { %533 = vsyncadd [#allocation6], 4294966256  ;;  %v426_v0 = vld [vmem:[#allocation5] sm:$0xff]   ;;  %v427_v1 = vld [vmem:[#allocation5 + $0x8] sm:$0xff]   ;;  %s541_s2 = smov [#allocation8]  }
  0x38   :  { %370 = vmatprep.subr.bf16.mxu0 %v426_v0  ;;  %402 = vmatprep.subr.bf16.mxu1 %v426_v0  ;;  %v428_v2 = vld [vmem:[#allocation5 + $0x10] sm:$0xff]   ;;  %v429_v3 = vld [vmem:[#allocation5 + $0x18] sm:$0xff]   ;;  %v434_v4 = vld [vmem:[#allocation2] sm:$0xff]   ;;  %s324_s22 = sshll.u32 %s541_s2, 4  ;;  %s325_s22 = int_to_ptr.vmem [resolvable:$true] %s324_s22 }
  0x39   :  { %371 = vmatpush3.bf16.msra.mxu0 %v426_v0  ;;  %410 = vmatpush3.bf16.msra.mxu1 %v426_v0  ;;  %v435_v5 = vld [vmem:[#allocation2 + $0x20] sm:$0xff]   ;;  %v431_v7 = vld [vmem:[#allocation5 + $0x28] sm:$0xff]   ;;  %v432_v8 = vld [vmem:[#allocation5 + $0x30] sm:$0xff]   ;;  %s508_s23 = scalar_lea.vmem %s325_s22, 2048  ;;  %p513_p11 = scmp.lt.s32.totalorder %s325_s22, %s325_s22 }
  0x3a   :  { %372 = vmatprep.subr.bf16.mxu0 %v427_v1  ;;  %403 = vmatprep.subr.bf16.mxu1 %v427_v1  ;;  %v430_v6 = vld [vmem:[#allocation5 + $0x20] sm:$0xff]   ;;  %v433_v9 = vld [vmem:[#allocation5 + $0x38] sm:$0xff]   ;;  %v436_v10 = vld [vmem:[#allocation2 + $0x8] sm:$0xff]   ;;  %p509_p10 = scmp.ne.s32.totalorder %s325_s22, %s508_s23  ;;  %p514_p12 = scmp.lt.s32.totalorder %s508_s23, %s508_s23 }
  0x3b   :  { %386 = vmatprep.mubr.bf16.mxu0 %v434_v4  ;;  %394 = vmatprep.mubr.bf16.mxu1 %v435_v5  ;;  %v437_v11 = vld [vmem:[#allocation2 + $0x28] sm:$0xff]   ;;  %v438_v12 = vld [vmem:[#allocation2 + $0x10] sm:$0xff]   ;;  %v440_v14 = vld [vmem:[#allocation2 + $0x18] sm:$0xff]  }
  0x3c   :  { %v439_v13 = vld [vmem:[#allocation2 + $0x30] sm:$0xff]   ;;  %v441_v15 = vld [vmem:[#allocation2 + $0x38] sm:$0xff]   ;;  %v337_v16 = vld [vmem:[#allocation7] ss:$0 sm:$0xff]  ;;  %p515_p13 = por %p514_p12, %p513_p11 }
  0x3d   :  { %373 = vmatpush3.bf16.msra.mxu0 %v427_v1  ;;  %411 = vmatpush3.bf16.msra.mxu1 %v427_v1 }
  0x3e   :  { %374 = vmatprep.subr.bf16.mxu0 %v428_v2  ;;  %404 = vmatprep.subr.bf16.mxu1 %v428_v2  ;;  %p516_p0 = pnand %p515_p13, %p509_p10 }
  0x41   :  { %375 = vmatpush3.bf16.msra.mxu0 %v428_v2  ;;  %412 = vmatpush3.bf16.msra.mxu1 %v428_v2 }
  0x42   :  { %376 = vmatprep.subr.bf16.mxu0 %v429_v3  ;;  %405 = vmatprep.subr.bf16.mxu1 %v429_v3 }
  0x45   :  { %377 = vmatpush3.bf16.msra.mxu0 %v429_v3  ;;  %413 = vmatpush3.bf16.msra.mxu1 %v429_v3 }
  0x46   :  { %378 = vmatprep.subr.bf16.mxu0 %v430_v6  ;;  %406 = vmatprep.subr.bf16.mxu1 %v430_v6 }
  0x49   :  { %379 = vmatpush3.bf16.msra.mxu0 %v430_v6  ;;  %414 = vmatpush3.bf16.msra.mxu1 %v430_v6 }
  0x4a   :  { %380 = vmatprep.subr.bf16.mxu0 %v431_v7  ;;  %407 = vmatprep.subr.bf16.mxu1 %v431_v7 }
  0x4d   :  { %381 = vmatpush3.bf16.msra.mxu0 %v431_v7  ;;  %415 = vmatpush3.bf16.msra.mxu1 %v431_v7 }
  0x4e   :  { %382 = vmatprep.subr.bf16.mxu0 %v432_v8  ;;  %408 = vmatprep.subr.bf16.mxu1 %v432_v8 }
  0x51   :  { %383 = vmatpush3.bf16.msra.mxu0 %v432_v8  ;;  %416 = vmatpush3.bf16.msra.mxu1 %v432_v8 }
  0x52   :  { %384 = vmatprep.subr.bf16.mxu0 %v433_v9  ;;  %409 = vmatprep.subr.bf16.mxu1 %v433_v9 }
  0x55   :  { %385 = vmatpush3.bf16.msra.mxu0 %v433_v9  ;;  %417 = vmatpush3.bf16.msra.mxu1 %v433_v9 }
  0x58   :  { %387 = vmatmul.mubr.bf16.vlgmr.msra.gmra.mrb[0].mxu0 %v436_v10  ;;  %395 = vmatmul.mubr.bf16.vlgmr.msra.gmra.mrb[0].mxu1 %v437_v11 }
  0x59   :  { %390 = vmatprep.mubr.bf16.mxu0 %v438_v12  ;;  %398 = vmatprep.mubr.bf16.mxu1 %v439_v13 }
  0x60   :  { %391 = vmatmul.mubr.bf16.gmra.mrb[4].mxu0 %v440_v14  ;;  %399 = vmatmul.mubr.bf16.gmra.mrb[4].mxu1 %v441_v15 }
 0x12b   :  { %v388_v17 = vpop.f32.mrb[0].mxu0  ;;  %v396_v18 = vpop.f32.mrb[0].mxu1 }
 0x12c   :  { %v233_v19 = vadd.f32 %v388_v17, %v337_v16  ;;  %v265_v20 = vadd.f32 %v396_v18, %v337_v16  ;;  %v224_v21 = vpop.f32.mrb[1].mxu0  ;;  %v256_v22 = vpop.f32.mrb[1].mxu1 }
 0x12d   :  { %v225_v23 = vadd.f32 %v337_v16, %v224_v21  ;;  %v257_v24 = vadd.f32 %v337_v16, %v256_v22  ;;  %v389_v25 = vpop.f32.mrb[2].mxu0  ;;  %v397_v26 = vpop.f32.mrb[2].mxu1 }
 0x12e   :  { %v289_v27 = vmax.f32 %v233_v19, 0.0  ;;  %v297_v28 = vmax.f32 %v265_v20, 0.0  ;;  %v236_v29 = vadd.f32 %v389_v25, %v337_v16  ;;  %v268_v30 = vadd.f32 %v397_v26, %v337_v16  ;;  %v227_v31 = vpop.f32.mrb[3].mxu0  ;;  %v259_v32 = vpop.f32.mrb[3].mxu1 }
 0x12f   :  { %v287_v33 = vmax.f32 %v225_v23, 0.0  ;;  %v295_v34 = vmax.f32 %v257_v24, 0.0  ;;  %v228_v35 = vadd.f32 %v337_v16, %v227_v31  ;;  %v260_v36 = vadd.f32 %v337_v16, %v259_v32 }
 0x130   :  { %305 = vst [vmem:[#allocation8 + $0x10] sm:$0xff] %v289_v27  ;;  %313 = vst [vmem:[#allocation8 + $0x50] sm:$0xff] %v297_v28  ;;  %v290_v37 = vmax.f32 %v236_v29, 0.0  ;;  %v298_v38 = vmax.f32 %v268_v30, 0.0 }
 0x131   :  { %303 = vst [vmem:[#allocation8] sm:$0xff] %v287_v33  ;;  %311 = vst [vmem:[#allocation8 + $0x40] sm:$0xff] %v295_v34  ;;  %v288_v39 = vmax.f32 %v228_v35, 0.0  ;;  %v296_v40 = vmax.f32 %v260_v36, 0.0 }
 0x132   :  { %306 = vst [vmem:[#allocation8 + $0x18] sm:$0xff] %v290_v37  ;;  %314 = vst [vmem:[#allocation8 + $0x58] sm:$0xff] %v298_v38 }
 0x133   :  { %304 = vst [vmem:[#allocation8 + $0x8] sm:$0xff] %v288_v39  ;;  %312 = vst [vmem:[#allocation8 + $0x48] sm:$0xff] %v296_v40  ;;  %v392_v41 = vpop.f32.mrb[4].mxu0  ;;  %v400_v42 = vpop.f32.mrb[4].mxu1 }
 0x134   :  { %v249_v43 = vadd.f32 %v392_v41, %v337_v16  ;;  %v281_v44 = vadd.f32 %v400_v42, %v337_v16  ;;  %v240_v45 = vpop.f32.mrb[5].mxu0  ;;  %v272_v46 = vpop.f32.mrb[5].mxu1 }
 0x135   :  { %v241_v47 = vadd.f32 %v337_v16, %v240_v45  ;;  %v273_v48 = vadd.f32 %v337_v16, %v272_v46  ;;  %v393_v49 = vpop.f32.mrb[6].mxu0  ;;  %v401_v50 = vpop.f32.mrb[6].mxu1 }
 0x136   :  { %v293_v51 = vmax.f32 %v249_v43, 0.0  ;;  %v301_v52 = vmax.f32 %v281_v44, 0.0  ;;  %v252_v53 = vadd.f32 %v393_v49, %v337_v16  ;;  %v284_v54 = vadd.f32 %v401_v50, %v337_v16  ;;  %v243_v55 = vpop.f32.mrb[7].mxu0  ;;  %v275_v56 = vpop.f32.mrb[7].mxu1 }
 0x137   :  { %v291_v57 = vmax.f32 %v241_v47, 0.0  ;;  %v299_v58 = vmax.f32 %v273_v48, 0.0  ;;  %v244_v59 = vadd.f32 %v337_v16, %v243_v55  ;;  %v276_v60 = vadd.f32 %v337_v16, %v275_v56 }
 0x138   :  { %309 = vst [vmem:[#allocation8 + $0x30] sm:$0xff] %v293_v51  ;;  %317 = vst [vmem:[#allocation8 + $0x70] sm:$0xff] %v301_v52  ;;  %v294_v61 = vmax.f32 %v252_v53, 0.0  ;;  %v302_v62 = vmax.f32 %v284_v54, 0.0 }
 0x139   :  { %307 = vst [vmem:[#allocation8 + $0x20] sm:$0xff] %v291_v57  ;;  %315 = vst [vmem:[#allocation8 + $0x60] sm:$0xff] %v299_v58  ;;  %v292_v63 = vmax.f32 %v244_v59, 0.0  ;;  %v300_v0 = vmax.f32 %v276_v60, 0.0 }
 0x13a   :  { %310 = vst [vmem:[#allocation8 + $0x38] sm:$0xff] %v294_v61  ;;  %318 = vst [vmem:[#allocation8 + $0x78] sm:$0xff] %v302_v62 }
 0x13b   :  { %308 = vst [vmem:[#allocation8 + $0x28] sm:$0xff] %v292_v63  ;;  %316 = vst [vmem:[#allocation8 + $0x68] sm:$0xff] %v300_v0 }
 0x13c   :  { %519 = shalt.err (!%p516_p0)
}
 0x13d   :  { %s520_s26 = scalar_lea.hbm %s622_s3, 2048 }
 0x13e   :  { %p521_p1 = scmp.ne.s32.totalorder %s622_s3, %s520_s26  ;;  %p524_p2 = scmp.lt.u32.totalorder %s520_s26, %s622_s3 }
 0x140   :  { %p526_p3 = pnand %p524_p2, %p521_p1 }
 0x142   :  { %529 = shalt.err (!%p526_p3)
}
 0x143   :  { %s542_s4 = smov 128   ;;  %s543_s5 = smov 8  }
 0x144   :  { %330 = dma.vmem_to_hbm [thread:$0]  %s325_s22, 2048, %s622_s3, [#allocation4], %s542_s4, %s542_s4, %s543_s5  }
 0x145   :  { %534 = dma.done.wait [#allocation4], 2048  }
 0x146   :  { %535 = vsyncadd [#allocation4], 4294965248 }
 0x147   :  { %334 = vsyncpa [#allocation3], 1 }
 0x148   :  { %335 = vsyncpa [#allocation6], 1 }
 0x149   :  { %336 = vsyncpa [#allocation4], 1 }

</bundles_post_ra>
